<compile_context>
chip_gen: v5e
topology: v5e:2x2
jax: 0.10.0
libtpu: 0.0.40
codegen_flags: <defaults>
</compile_context>

<pallas_src>
import jax
import jax.numpy as jnp
from jax.experimental import pallas as pl
from jax.experimental.pallas import tpu as pltpu


def _round_up(x, m):
    return (x + m - 1) // m * m


# ----------------------------------------------------------------------------
# Kernel
# ----------------------------------------------------------------------------
def siamese_kernel(a_ref, b_ref, w1_ref, b1_ref, w2_ref, b2_ref,
                   wc_ref, bc_ref, out_ref, x_scr):
    """Siamese forward for one batch tile.

    a_ref, b_ref : (TB, D)      input dtype (f32 or bf16), streamed per step
    w1_ref       : (D,  Hp)     bf16  (VMEM-resident)   b1_ref: (1, Hp) f32
    w2_ref       : (Hp, Ep)     bf16  (VMEM-resident)   b2_ref: (1, Ep) f32
    wc_ref       : (1, Ep)      bf16  (VMEM-resident)   bc_ref: (1, 1)  f32 SMEM
    out_ref      : (1, TB)      f32   lane-dense (batch on the lane axis)
    x_scr        : (2*TB, D)    bf16  VMEM scratch for branch stacking
    """
    tb = a_ref.shape[0]

    # Stack the two branches along the batch (sublane) axis so the shared-weight
    # MLP runs as a single matmul chain with effective M = 2*TB.  The cast to
    # bf16 happens on the store, so no separate full-tile cast pass and half the
    # scratch traffic vs. an f32 scratch.
    x_scr[0:tb, :] = a_ref[...].astype(jnp.bfloat16)
    x_scr[tb:2 * tb, :] = b_ref[...].astype(jnp.bfloat16)
    x = x_scr[...]                                          # (2TB, D) bf16 -> MXU LHS

    # Linear -> ReLU -> Linear, bf16 operands, f32 accumulation.
    h = jnp.dot(x, w1_ref[...], preferred_element_type=jnp.float32) + b1_ref[...]
    h = jnp.maximum(h, 0.0)                                 # ReLU in f32 (VPU)
    emb = jnp.dot(h.astype(jnp.bfloat16), w2_ref[...],
                  preferred_element_type=jnp.float32) + b2_ref[...]   # (2TB, Ep) f32

    emb_a = emb[0:tb, :]
    emb_b = emb[tb:2 * tb, :]
    dist = jnp.abs(emb_a - emb_b)                           # (TB, Ep) f32

    # Classification head Linear(E -> 1), computed transposed so the result is
    # produced directly as a lane-dense (1, TB) row: out = wc (1,E) . dist^T.
    # bf16 operands, f32 accumulate.
    out_row = jax.lax.dot_general(
        wc_ref[...], dist.astype(jnp.bfloat16),
        dimension_numbers=(((1,), (1,)), ((), ())),
        preferred_element_type=jnp.float32)                 # (1, TB)
    out_ref[...] = (out_row + bc_ref[0, 0]).astype(out_ref.dtype)


# ----------------------------------------------------------------------------
# One-time parameter preparation (hoisted out of the per-call forward)
# ----------------------------------------------------------------------------
def prepare_params(params):
    """Pad weight feature dims to 128 lanes and cast matmul weights to bf16.

    Call once (e.g. at model load); the result is passed to siamese_forward.
    Zero pad rows/columns contribute nothing numerically.
    """
    w1, b1, w2, b2, wc, bc = params
    D, H = w1.shape
    E = w2.shape[1]
    Hp = _round_up(H, 128)
    Ep = _round_up(E, 128)

    w1p = jnp.zeros((D, Hp), jnp.bfloat16).at[:, :H].set(w1.astype(jnp.bfloat16))
    b1p = jnp.zeros((1, Hp), jnp.float32).at[:, :H].set(
        b1.astype(jnp.float32).reshape(1, H))
    w2p = jnp.zeros((Hp, Ep), jnp.bfloat16).at[:H, :E].set(w2.astype(jnp.bfloat16))
    b2p = jnp.zeros((1, Ep), jnp.float32).at[:, :E].set(
        b2.astype(jnp.float32).reshape(1, E))
    wcp = jnp.zeros((1, Ep), jnp.bfloat16).at[:, :E].set(
        wc.astype(jnp.bfloat16).reshape(1, E))
    bcp = bc.astype(jnp.float32).reshape(1, 1)
    return (w1p, b1p, w2p, b2p, wcp, bcp)


# ----------------------------------------------------------------------------
# Tile-size selection (D-aware, VMEM-budget aware, v7x megacore aware)
# ----------------------------------------------------------------------------
def _vmem_estimate(tb, d, hp, ep, in_bytes):
    stream = 2 * 2 * tb * d * in_bytes            # a,b streams, double-buffered
    scratch = 2 * tb * d * 2                       # bf16 stacking scratch
    inter = 2 * tb * (hp + ep) * 4 + tb * ep * 4   # h, emb (f32), dist
    outbuf = 2 * 1 * tb * 4                        # (1, TB) f32, double-buffered
    weights = d * hp * 2 + hp * ep * 2 + (hp + 2 * ep) * 4
    return stream + scratch + inter + outbuf + weights


def _choose_tb(B, D, in_bytes, Hp, Ep, *,
               target_stream_bytes=2 << 20,        # ~2 MiB of a/b per grid step
               vmem_budget=12 << 20,               # < v5e's 16 MiB default scope
               max_tb=2048):
    # Size TB so each step streams ~target bytes of inputs (overhead amortization).
    tb = max(128, (target_stream_bytes // max(1, 2 * D * in_bytes)) // 128 * 128)
    tb = min(tb, max_tb)
    # Shrink until the whole per-step footprint fits the smallest default scoped
    # VMEM limit (v5e 16 MiB; also comfortably under v7x's 64 MiB physical).
    while tb > 128 and _vmem_estimate(tb, D, Hp, Ep, in_bytes) > vmem_budget:
        tb -= 128
    # Never bigger than the (lane-padded) batch.
    tb = min(tb, _round_up(B, 128))
    # v7x megacore: keep >= 2 grid steps when the batch spans >= 2 tiles so the
    # "parallel" batch axis actually shards across both TensorCores.
    if _round_up(B, 128) >= 256:
        tb = min(tb, _round_up((B + 1) // 2, 128))
    return tb


# ----------------------------------------------------------------------------
# Forward wrapper
# ----------------------------------------------------------------------------
def siamese_forward(a, b, prepared_params):
    """Siamese forward: returns logits of shape (B, 1) like the PyTorch module.

    `prepared_params` must come from prepare_params() (padded / bf16 weights).
    a and b may be f32 or bf16; they are streamed in their native dtype.
    """
    w1p, b1p, w2p, b2p, wcp, bcp = prepared_params
    B, D = a.shape
    Hp = w1p.shape[1]
    Ep = w2p.shape[1]
    in_bytes = jnp.dtype(a.dtype).itemsize

    TB = _choose_tb(B, D, in_bytes, Hp, Ep)
    Bp = _round_up(B, TB)
    if Bp != B:
        a = jnp.zeros((Bp, D), a.dtype).at[:B].set(a)
        b = jnp.zeros((Bp, D), b.dtype).at[:B].set(b)

    batch_spec = pl.BlockSpec((TB, D), lambda i: (i, 0))
    resident = lambda shape: pl.BlockSpec(shape, lambda i: (0, 0))

    out = pl.pallas_call(
        siamese_kernel,
        out_shape=jax.ShapeDtypeStruct((1, Bp), jnp.float32),
        grid=(Bp // TB,),
        in_specs=[
            batch_spec,                                     # a  (streamed)
            batch_spec,                                     # b  (streamed)
            resident((D, Hp)),                              # w1 (resident, bf16)
            resident((1, Hp)),                              # b1 (f32)
            resident((Hp, Ep)),                             # w2 (resident, bf16)
            resident((1, Ep)),                              # b2 (f32)
            resident((1, Ep)),                              # wc (bf16 lane row)
            pl.BlockSpec(memory_space=pltpu.MemorySpace.SMEM),  # bc scalar
        ],
        out_specs=pl.BlockSpec((1, TB), lambda i: (0, i)),  # lane-dense output
        scratch_shapes=[pltpu.VMEM((2 * TB, D), jnp.bfloat16)],
        compiler_params=pltpu.CompilerParams(
            dimension_semantics=("parallel",),              # megacore on v7x
        ),
    )(a, b, w1p, b1p, w2p, b2p, wcp, bcp)

    return out[0, :B].reshape(B, 1)


# ----------------------------------------------------------------------------
# Reference + demo
# ----------------------------------------------------------------------------
def init_params(key, d_in, hidden, emb):
    ks = jax.random.split(key, 6)
    scale = lambda fan_in: 1.0 / jnp.sqrt(jnp.float32(fan_in))
    w1 = jax.random.uniform(ks[0], (d_in, hidden), jnp.float32, -1, 1) * scale(d_in)
    b1 = jax.random.uniform(ks[1], (1, hidden), jnp.float32, -1, 1) * scale(d_in)
    w2 = jax.random.uniform(ks[2], (hidden, emb), jnp.float32, -1, 1) * scale(hidden)
    b2 = jax.random.uniform(ks[3], (1, emb), jnp.float32, -1, 1) * scale(hidden)
    wc = jax.random.uniform(ks[4], (emb, 1), jnp.float32, -1, 1) * scale(emb)
    bc = jax.random.uniform(ks[5], (1, 1), jnp.float32, -1, 1) * scale(emb)
    return (w1, b1, w2, b2, wc, bc)


def reference_forward(a, b, params):
    """Pure-JAX f32 reference of the same forward for a correctness check."""
    w1, b1, w2, b2, wc, bc = params

    def embed(x):
        h = jnp.maximum(x @ w1 + b1, 0.0)
        return h @ w2 + b2

    d = jnp.abs(embed(a) - embed(b))
    return d @ wc + bc


if __name__ == "__main__":
    B, D_IN, HIDDEN, EMB = 2, 32, 64, 32

    key = jax.random.PRNGKey(0)
    k_a, k_b, k_p = jax.random.split(key, 3)
    a = jax.random.normal(k_a, (B, D_IN), jnp.float32)
    b = jax.random.normal(k_b, (B, D_IN), jnp.float32)
    params = init_params(k_p, D_IN, HIDDEN, EMB)

    # One-time weight padding / bf16 casting, hoisted out of the forward call.
    prepared = prepare_params(params)

    out = siamese_forward(a, b, prepared)
    out = jax.block_until_ready(out)

    ref = reference_forward(a, b, params)
    assert out.shape == (B, 1)
    # bf16 MXU operands (including the bf16 classifier head) with f32
    # accumulation -> loosened tolerance vs. the f32 reference.
    assert jnp.allclose(out, ref, atol=3e-2, rtol=3e-2)

    print("KERNEL_OK")
</pallas_src>

<mosaic_0001>
module attributes {stable_mosaic.version = 11 : i64} {
  func.func @siamese_kernel(%arg0: i32, %arg1: memref<128x32xf32, #tpu.memory_space<vmem>>, %arg2: memref<128x32xf32, #tpu.memory_space<vmem>>, %arg3: memref<32x128xbf16, #tpu.memory_space<vmem>>, %arg4: memref<1x128xf32, #tpu.memory_space<vmem>>, %arg5: memref<128x128xbf16, #tpu.memory_space<vmem>>, %arg6: memref<1x128xf32, #tpu.memory_space<vmem>>, %arg7: memref<1x128xbf16, #tpu.memory_space<vmem>>, %arg8: memref<1x1xf32, #tpu.memory_space<smem>>, %arg9: memref<1x128xf32, #tpu.memory_space<vmem>>, %arg10: memref<256x32xbf16, #tpu.memory_space<vmem>>) attributes {dimension_semantics = [#tpu.dimension_semantics<parallel>], iteration_bounds = array<i64: 1>, scalar_prefetch = 0 : i64, scratch_operands = 1 : i64, tpu.core_type = #tpu.core_type<tc>, window_params = [{transform_indices = @transform_0, window_bounds = array<i64: 128, 32>}, {transform_indices = @transform_1, window_bounds = array<i64: 128, 32>}, {pipeline_mode = #tpu.pipeline_mode<synchronous>, transform_indices = @transform_2, window_bounds = array<i64: 32, 128>}, {pipeline_mode = #tpu.pipeline_mode<synchronous>, transform_indices = @transform_3, window_bounds = array<i64: 1, 128>}, {pipeline_mode = #tpu.pipeline_mode<synchronous>, transform_indices = @transform_4, window_bounds = array<i64: 128, 128>}, {pipeline_mode = #tpu.pipeline_mode<synchronous>, transform_indices = @transform_5, window_bounds = array<i64: 1, 128>}, {pipeline_mode = #tpu.pipeline_mode<synchronous>, transform_indices = @transform_6, window_bounds = array<i64: 1, 128>}, {transform_indices = @transform_7, window_bounds = array<i64: 1, 1>}, {transform_indices = @transform_8, window_bounds = array<i64: 1, 128>}]} {
    %c0 = arith.constant 0 : index
    %c0_0 = arith.constant 0 : index
    %0 = vector.load %arg1[%c0, %c0_0] : memref<128x32xf32, #tpu.memory_space<vmem>>, vector<128x32xf32>
    %1 = arith.truncf %0 : vector<128x32xf32> to vector<128x32xbf16>
    %c0_1 = arith.constant 0 : index
    %c0_2 = arith.constant 0 : index
    %2 = vector.load %arg10[%c0_1, %c0_2] : memref<256x32xbf16, #tpu.memory_space<vmem>>, vector<128x32xbf16>
    tpu.vector_store %arg10[%c0_1, %c0_2], %1 {strides = array<i32>} : memref<256x32xbf16, #tpu.memory_space<vmem>>, vector<128x32xbf16>,
    %c0_3 = arith.constant 0 : index
    %c0_4 = arith.constant 0 : index
    %3 = vector.load %arg2[%c0_3, %c0_4] : memref<128x32xf32, #tpu.memory_space<vmem>>, vector<128x32xf32>
    %4 = arith.truncf %3 : vector<128x32xf32> to vector<128x32xbf16>
    %c128 = arith.constant 128 : index
    %c0_5 = arith.constant 0 : index
    %5 = vector.load %arg10[%c128, %c0_5] : memref<256x32xbf16, #tpu.memory_space<vmem>>, vector<128x32xbf16>
    tpu.vector_store %arg10[%c128, %c0_5], %4 {strides = array<i32>} : memref<256x32xbf16, #tpu.memory_space<vmem>>, vector<128x32xbf16>,
    %c0_6 = arith.constant 0 : index
    %c0_7 = arith.constant 0 : index
    %6 = vector.load %arg10[%c0_6, %c0_7] : memref<256x32xbf16, #tpu.memory_space<vmem>>, vector<256x32xbf16>
    %c0_8 = arith.constant 0 : index
    %c0_9 = arith.constant 0 : index
    %7 = vector.load %arg3[%c0_8, %c0_9] : memref<32x128xbf16, #tpu.memory_space<vmem>>, vector<32x128xbf16>
    %cst = arith.constant dense<0.000000e+00> : vector<256x128xf32>
    %8 = tpu.matmul %6, %7, %cst {dimension_numbers = #tpu.dot_dimension_numbers<[1], [0], [0], [1], [0, 0, 1, 1], [], []>} : vector<256x32xbf16>, vector<32x128xbf16>, vector<256x128xf32> -> vector<256x128xf32>
    %c0_10 = arith.constant 0 : index
    %c0_11 = arith.constant 0 : index
    %9 = vector.load %arg4[%c0_10, %c0_11] : memref<1x128xf32, #tpu.memory_space<vmem>>, vector<1x128xf32>
    %10 = vector.broadcast %9 : vector<1x128xf32> to vector<256x128xf32>
    %11 = arith.addf %8, %10 : vector<256x128xf32>
    %cst_12 = arith.constant 0.000000e+00 : f32
    %12 = vector.broadcast %cst_12 : f32 to vector<256x128xf32>
    %13 = arith.maximumf %11, %12 : vector<256x128xf32>
    %14 = arith.truncf %13 : vector<256x128xf32> to vector<256x128xbf16>
    %c0_13 = arith.constant 0 : index
    %c0_14 = arith.constant 0 : index
    %15 = vector.load %arg5[%c0_13, %c0_14] : memref<128x128xbf16, #tpu.memory_space<vmem>>, vector<128x128xbf16>
    %cst_15 = arith.constant dense<0.000000e+00> : vector<256x128xf32>
    %16 = tpu.matmul %14, %15, %cst_15 {dimension_numbers = #tpu.dot_dimension_numbers<[1], [0], [0], [1], [0, 0, 1, 1], [], []>} : vector<256x128xbf16>, vector<128x128xbf16>, vector<256x128xf32> -> vector<256x128xf32>
    %c0_16 = arith.constant 0 : index
    %c0_17 = arith.constant 0 : index
    %17 = vector.load %arg6[%c0_16, %c0_17] : memref<1x128xf32, #tpu.memory_space<vmem>>, vector<1x128xf32>
    %18 = vector.broadcast %17 : vector<1x128xf32> to vector<256x128xf32>
    %19 = arith.addf %16, %18 : vector<256x128xf32>
    %20 = vector.extract_strided_slice %19 {offsets = [0, 0], sizes = [128, 128], strides = [1, 1]} : vector<256x128xf32> to vector<128x128xf32>
    %21 = vector.extract_strided_slice %19 {offsets = [128, 0], sizes = [128, 128], strides = [1, 1]} : vector<256x128xf32> to vector<128x128xf32>
    %22 = arith.subf %20, %21 : vector<128x128xf32>
    %23 = math.absf %22 : vector<128x128xf32>
    %c0_18 = arith.constant 0 : index
    %c0_19 = arith.constant 0 : index
    %24 = vector.load %arg7[%c0_18, %c0_19] : memref<1x128xbf16, #tpu.memory_space<vmem>>, vector<1x128xbf16>
    %25 = arith.truncf %23 : vector<128x128xf32> to vector<128x128xbf16>
    %cst_20 = arith.constant dense<0.000000e+00> : vector<1x128xf32>
    %26 = tpu.matmul %24, %25, %cst_20 {dimension_numbers = #tpu.dot_dimension_numbers<[1], [1], [0], [0], [0, 0, 1, 0], [], []>} : vector<1x128xbf16>, vector<128x128xbf16>, vector<1x128xf32> -> vector<1x128xf32>
    %c0_21 = arith.constant 0 : index
    %c0_22 = arith.constant 0 : index
    %27 = memref.load %arg8[%c0_21, %c0_22] : memref<1x1xf32, #tpu.memory_space<smem>>
    %28 = vector.broadcast %27 : f32 to vector<1x128xf32>
    %29 = arith.addf %26, %28 : vector<1x128xf32>
    %c0_23 = arith.constant 0 : index
    %c0_24 = arith.constant 0 : index
    %30 = vector.load %arg9[%c0_23, %c0_24] : memref<1x128xf32, #tpu.memory_space<vmem>>, vector<1x128xf32>
    tpu.vector_store %arg9[%c0_23, %c0_24], %29 {strides = array<i32>} : memref<1x128xf32, #tpu.memory_space<vmem>>, vector<1x128xf32>,
    return
  }
  func.func @transform_0(%arg0: i32) -> (i32, i32) {
    %c0_i32 = arith.constant 0 : i32
    %c0_i32_0 = arith.constant 0 : i32
    return %arg0, %c0_i32 : i32, i32
  }
  func.func @transform_1(%arg0: i32) -> (i32, i32) {
    %c0_i32 = arith.constant 0 : i32
    %c0_i32_0 = arith.constant 0 : i32
    return %arg0, %c0_i32 : i32, i32
  }
  func.func @transform_2(%arg0: i32) -> (i32, i32) {
    %c0_i32 = arith.constant 0 : i32
    %c0_i32_0 = arith.constant 0 : i32
    %c0_i32_1 = arith.constant 0 : i32
    return %c0_i32, %c0_i32_0 : i32, i32
  }
  func.func @transform_3(%arg0: i32) -> (i32, i32) {
    %c0_i32 = arith.constant 0 : i32
    %c0_i32_0 = arith.constant 0 : i32
    %c0_i32_1 = arith.constant 0 : i32
    return %c0_i32, %c0_i32_0 : i32, i32
  }
  func.func @transform_4(%arg0: i32) -> (i32, i32) {
    %c0_i32 = arith.constant 0 : i32
    %c0_i32_0 = arith.constant 0 : i32
    %c0_i32_1 = arith.constant 0 : i32
    return %c0_i32, %c0_i32_0 : i32, i32
  }
  func.func @transform_5(%arg0: i32) -> (i32, i32) {
    %c0_i32 = arith.constant 0 : i32
    %c0_i32_0 = arith.constant 0 : i32
    %c0_i32_1 = arith.constant 0 : i32
    return %c0_i32, %c0_i32_0 : i32, i32
  }
  func.func @transform_6(%arg0: i32) -> (i32, i32) {
    %c0_i32 = arith.constant 0 : i32
    %c0_i32_0 = arith.constant 0 : i32
    %c0_i32_1 = arith.constant 0 : i32
    return %c0_i32, %c0_i32_0 : i32, i32
  }
  func.func @transform_7(%arg0: i32) -> (i32, i32) {
    %c0_i32 = arith.constant 0 : i32
    %c0_i32_0 = arith.constant 0 : i32
    %c0_i32_1 = arith.constant 0 : i32
    return %c0_i32, %c0_i32_0 : i32, i32
  }
  func.func @transform_8(%arg0: i32) -> (i32, i32) {
    %c0_i32 = arith.constant 0 : i32
    %c0_i32_0 = arith.constant 0 : i32
    return %c0_i32, %arg0 : i32, i32
  }
}

</mosaic_0001>

<bundles_post_ra>
// kernel: tpu_custom_call.1
= control target key start
LH: loop header
LB: loop body
LE: loop exit
PB: predicated region body
PF: predicated region fallthrough
CT: control target
= control target key end

     0   :  { %vm64_vm0 = vcmask 257024   ;;  %s1198_s0 = inlined_call_operand.vmem [shape: f32[128,32], index: 0, kind: input, shape index: {}]   ;;  %s1199_s1 = inlined_call_operand.vmem [shape: f32[128,32], index: 1, kind: input, shape index: {}]   ;;  %s1200_s2 = inlined_call_operand.vmem [shape: bf16[32,128], index: 2, kind: input, shape index: {}]   ;;  %s1201_s3 = inlined_call_operand.vmem [shape: f32[1,128], index: 3, kind: input, shape index: {}]   ;;  %s1202_s4 = inlined_call_operand.vmem [shape: bf16[128,128], index: 4, kind: input, shape index: {}]   ;;  %s1203_s5 = inlined_call_operand.vmem [shape: f32[1,128], index: 5, kind: input, shape index: {}]   ;;  %s1204_s6 = inlined_call_operand.vmem [shape: bf16[1,128], index: 6, kind: input, shape index: {}]   ;;  %s1205_s7 = inlined_call_operand.<no memory space> [shape: f32[1,1], index: 7, kind: input, shape index: {}]   ;;  %s1206_s8 = inlined_call_operand.hbm [shape: f32[1,128], index: 8, kind: output, shape index: {}]  }
   0x1   :  { %v814_v0 = vld [vmem:[%s1200_s2 + $0x8] sm:$0xff]  ;;  %v813_v1 = vld [vmem:[%s1200_s2] sm:$0xff]  ;;  %v83_v5 = vld [vmem:[%s1199_s1 + $0x10] sm:$0xff] }
   0x2   :  { %v32_v2 = vld [vmem:[%s1198_s0] sm:$0xff]  ;;  %v33_v3 = vld [vmem:[%s1198_s0 + $0x8] sm:$0xff]  ;;  %v84_v6 = vld [vmem:[%s1199_s1 + $0x18] sm:$0xff]  ;;  %316 = vmatpush.bf16.msra.mxu0 %v814_v0  ;;  %823 = vmatpush.bf16.msra.mxu2 %v814_v0  ;;  %v99_v8 = vpack.c.bf16 %v83_v5, %v83_v5 }
   0x3   :  { %v48_v4 = vpack.c.bf16 %v32_v2, %v32_v2  ;;  %v49_v7 = vpack.c.bf16 %v33_v3, %v33_v3  ;;  %v100_v9 = vpack.c.bf16 %v84_v6, %v84_v6  ;;  %v34_v10 = vld [vmem:[%s1198_s0 + $0x10] sm:$0xff]  ;;  %v35_v11 = vld [vmem:[%s1198_s0 + $0x18] sm:$0xff]  ;;  %v85_v12 = vld [vmem:[%s1199_s1 + $0x20] sm:$0xff] }
   0x4   :  { %v50_v13 = vpack.c.bf16 %v34_v10, %v34_v10  ;;  %v86_v14 = vld [vmem:[%s1199_s1 + $0x28] sm:$0xff]  ;;  %v51_v15 = vpack.c.bf16 %v35_v11, %v35_v11  ;;  %v36_v16 = vld [vmem:[%s1198_s0 + $0x20] sm:$0xff]  ;;  %115 = vst.msk [vmem:[#allocation2 + $0x48] sm:$0xf] %vm64_vm0, %v99_v8  ;;  %v101_v18 = vpack.c.bf16 %v85_v12, %v85_v12 }
   0x5   :  { %65 = vst.msk [vmem:[#allocation2] sm:$0xf] %vm64_vm0, %v48_v4  ;;  %v37_v17 = vld [vmem:[%s1198_s0 + $0x28] sm:$0xff] }
   0x6   :  { %66 = vst.msk [vmem:[#allocation2 + $0x4] sm:$0xf] %vm64_vm0, %v49_v7 }
   0x7   :  { %14 = vsyncpa [#allocation5], 0  ;;  %317 = vmatpush.bf16.msra.mxu0 %v813_v1  ;;  %824 = vmatpush.bf16.msra.mxu2 %v813_v1  ;;  %116 = vst.msk [vmem:[#allocation2 + $0x4c] sm:$0xf] %vm64_vm0, %v100_v9  ;;  %v102_v19 = vpack.c.bf16 %v86_v14, %v86_v14  ;;  %v87_v20 = vld [vmem:[%s1199_s1 + $0x30] sm:$0xff]  ;;  %v52_v21 = vpack.c.bf16 %v36_v16, %v36_v16  ;;  %v88_v22 = vld [vmem:[%s1199_s1 + $0x38] sm:$0xff] }
   0x8   :  { %67 = vst.msk [vmem:[#allocation2 + $0x8] sm:$0xf] %vm64_vm0, %v50_v13  ;;  %v53_v23 = vpack.c.bf16 %v37_v17, %v37_v17  ;;  %v103_v24 = vpack.c.bf16 %v87_v20, %v87_v20  ;;  %vm261_vm1 = vcmask 261120   ;;  %v104_v25 = vpack.c.bf16 %v88_v22, %v88_v22  ;;  %v38_v28 = vld [vmem:[%s1198_s0 + $0x30] sm:$0xff]  ;;  %v39_v29 = vld [vmem:[%s1198_s0 + $0x38] sm:$0xff]  ;;  %v89_v32 = vld [vmem:[%s1199_s1 + $0x40] sm:$0xff] }
   0x9   :  { %68 = vst.msk [vmem:[#allocation2 + $0xc] sm:$0xf] %vm64_vm0, %v51_v15  ;;  %v54_v30 = vpack.c.bf16 %v38_v28, %v38_v28  ;;  %v55_v31 = vpack.c.bf16 %v39_v29, %v39_v29  ;;  %v90_v33 = vld [vmem:[%s1199_s1 + $0x48] sm:$0xff]  ;;  %v105_v34 = vpack.c.bf16 %v89_v32, %v89_v32  ;;  %v40_v38 = vld [vmem:[%s1198_s0 + $0x40] sm:$0xff]  ;;  %v91_v42 = vld [vmem:[%s1199_s1 + $0x50] sm:$0xff]  ;;  %s862_s22 = smov [#allocation4]  }
   0xa   :  { %117 = vst.msk [vmem:[#allocation2 + $0x50] sm:$0xf] %vm64_vm0, %v101_v18  ;;  %v106_v35 = vpack.c.bf16 %v90_v33, %v90_v33  ;;  %v41_v39 = vld [vmem:[%s1198_s0 + $0x48] sm:$0xff]  ;;  %v56_v40 = vpack.c.bf16 %v40_v38, %v40_v38  ;;  %v92_v43 = vld [vmem:[%s1199_s1 + $0x58] sm:$0xff]  ;;  %v107_v44 = vpack.c.bf16 %v91_v42, %v91_v42  ;;  %v42_v48 = vld [vmem:[%s1198_s0 + $0x50] sm:$0xff]  ;;  %s666_s23 = sshll.u32 %s862_s22, 4  ;;  %s667_s23 = int_to_ptr.vmem [resolvable:$true] %s666_s23 }
   0xb   :  { %118 = vst.msk [vmem:[#allocation2 + $0x54] sm:$0xf] %vm64_vm0, %v102_v19  ;;  %v57_v41 = vpack.c.bf16 %v41_v39, %v41_v39  ;;  %v108_v45 = vpack.c.bf16 %v92_v43, %v92_v43  ;;  %v43_v49 = vld [vmem:[%s1198_s0 + $0x58] sm:$0xff]  ;;  %v58_v50 = vpack.c.bf16 %v42_v48, %v42_v48  ;;  %v93_v52 = vld [vmem:[%s1199_s1 + $0x60] sm:$0xff]  ;;  %v94_v53 = vld [vmem:[%s1199_s1 + $0x68] sm:$0xff] }
   0xc   :  { %69 = vst.msk [vmem:[#allocation2 + $0x10] sm:$0xf] %vm64_vm0, %v52_v21  ;;  %v59_v51 = vpack.c.bf16 %v43_v49, %v43_v49  ;;  %v109_v54 = vpack.c.bf16 %v93_v52, %v93_v52  ;;  %v110_v55 = vpack.c.bf16 %v94_v53, %v94_v53  ;;  %v44_v58 = vld [vmem:[%s1198_s0 + $0x60] sm:$0xff]  ;;  %v45_v59 = vld [vmem:[%s1198_s0 + $0x68] sm:$0xff]  ;;  %v95_v62 = vld [vmem:[%s1199_s1 + $0x70] sm:$0xff] }
   0xd   :  { %v797_v26 = vld [vmem:[#allocation2] sm:$0xff]  ;;  %70 = vst.msk [vmem:[#allocation2 + $0x14] sm:$0xf] %vm64_vm0, %v53_v23  ;;  %v60_v60 = vpack.c.bf16 %v44_v58, %v44_v58  ;;  %v61_v61 = vpack.c.bf16 %v45_v59, %v45_v59  ;;  %v96_v63 = vld [vmem:[%s1199_s1 + $0x78] sm:$0xff]  ;;  %v111_v0 = vpack.c.bf16 %v95_v62, %v95_v62  ;;  %v46_v5 = vld [vmem:[%s1198_s0 + $0x70] sm:$0xff] }
   0xe   :  { %749 = vmatmul.msk.bf16.vlgmr.msra.gmra.mxu0 %vm261_vm1, %v797_v26  ;;  %v806_v27 = vld [vmem:[#allocation2 + $0x48] sm:$0xff]  ;;  %119 = vst.msk [vmem:[#allocation2 + $0x58] sm:$0xf] %vm64_vm0, %v103_v24  ;;  %v112_v1 = vpack.c.bf16 %v96_v63, %v96_v63  ;;  %v822_v4 = vld [vmem:[%s1202_s4 + $0x38] sm:$0xff]  ;;  %v62_v7 = vpack.c.bf16 %v46_v5, %v46_v5  ;;  %v821_v11 = vld [vmem:[%s1202_s4 + $0x30] sm:$0xff] }
   0xf   :  { %120 = vst.msk [vmem:[#allocation2 + $0x5c] sm:$0xf] %vm64_vm0, %v104_v25  ;;  %758 = vmatmul.msk.bf16.vlgmr.msra.gmra.mxu2 %vm261_vm1, %v806_v27  ;;  %v47_v6 = vld [vmem:[%s1198_s0 + $0x78] sm:$0xff]  ;;  %515 = vmatpush.bf16.msra.mxu1 %v822_v4  ;;  %v820_v12 = vld [vmem:[%s1202_s4 + $0x28] sm:$0xff]  ;;  %v819_v13 = vld [vmem:[%s1202_s4 + $0x20] sm:$0xff]  ;;  %s668_s0 = sshll.u32 %s1206_s8, 4  ;;  %s669_s0 = int_to_ptr.hbm [resolvable:$true] %s668_s0 }
  0x10   :  { %71 = vst.msk [vmem:[#allocation2 + $0x18] sm:$0xf] %vm64_vm0, %v54_v30  ;;  %v798_v36 = vld [vmem:[#allocation2 + $0x8] sm:$0xff]  ;;  %v63_v8 = vpack.c.bf16 %v47_v6, %v47_v6  ;;  %825 = vmatpush.bf16.msra.mxu3 %v822_v4  ;;  %v81_v14 = vld [vmem:[%s1199_s1] sm:$0xff]  ;;  %v818_v19 = vld [vmem:[%s1202_s4 + $0x18] sm:$0xff] }
  0x11   :  { %72 = vst.msk [vmem:[#allocation2 + $0x1c] sm:$0xf] %vm64_vm0, %v55_v31  ;;  %v82_v15 = vld [vmem:[%s1199_s1 + $0x8] sm:$0xff]  ;;  %v97_v16 = vpack.c.bf16 %v81_v14, %v81_v14  ;;  %v817_v21 = vld [vmem:[%s1202_s4 + $0x10] sm:$0xff]  ;;  %v815_v23 = vld [vmem:[%s1202_s4] sm:$0xff] }
  0x12   :  { %121 = vst.msk [vmem:[#allocation2 + $0x60] sm:$0xf] %vm64_vm0, %v105_v34  ;;  %v807_v37 = vld [vmem:[#allocation2 + $0x50] sm:$0xff]  ;;  %v98_v17 = vpack.c.bf16 %v82_v15, %v82_v15  ;;  %v816_v22 = vld [vmem:[%s1202_s4 + $0x8] sm:$0xff]  ;;  %v1084_v27 = vld [vmem:[%s1201_s3] ss:$0 sm:$0xff] }
  0x13   :  { %122 = vst.msk [vmem:[#allocation2 + $0x64] sm:$0xf] %vm64_vm0, %v106_v35  ;;  %516 = vmatpush.bf16.msra.mxu1 %v821_v11 }
  0x14   :  { %73 = vst.msk [vmem:[#allocation2 + $0x20] sm:$0xf] %vm64_vm0, %v56_v40  ;;  %v799_v46 = vld [vmem:[#allocation2 + $0x10] sm:$0xff]  ;;  %826 = vmatpush.bf16.msra.mxu3 %v821_v11 }
  0x15   :  { %74 = vst.msk [vmem:[#allocation2 + $0x24] sm:$0xf] %vm64_vm0, %v57_v41 }
  0x16   :  { %123 = vst.msk [vmem:[#allocation2 + $0x68] sm:$0xf] %vm64_vm0, %v107_v44  ;;  %v808_v47 = vld [vmem:[#allocation2 + $0x58] sm:$0xff] }
  0x17   :  { %124 = vst.msk [vmem:[#allocation2 + $0x6c] sm:$0xf] %vm64_vm0, %v108_v45  ;;  %517 = vmatpush.bf16.msra.mxu1 %v820_v12 }
  0x18   :  { %75 = vst.msk [vmem:[#allocation2 + $0x28] sm:$0xf] %vm64_vm0, %v58_v50  ;;  %v800_v56 = vld [vmem:[#allocation2 + $0x18] sm:$0xff]  ;;  %827 = vmatpush.bf16.msra.mxu3 %v820_v12 }
  0x19   :  { %76 = vst.msk [vmem:[#allocation2 + $0x2c] sm:$0xf] %vm64_vm0, %v59_v51 }
  0x1a   :  { %125 = vst.msk [vmem:[#allocation2 + $0x70] sm:$0xf] %vm64_vm0, %v109_v54  ;;  %v809_v57 = vld [vmem:[#allocation2 + $0x60] sm:$0xff] }
  0x1b   :  { %126 = vst.msk [vmem:[#allocation2 + $0x74] sm:$0xf] %vm64_vm0, %v110_v55  ;;  %518 = vmatpush.bf16.msra.mxu1 %v819_v13 }
  0x1c   :  { %77 = vst.msk [vmem:[#allocation2 + $0x30] sm:$0xf] %vm64_vm0, %v60_v60  ;;  %v801_v2 = vld [vmem:[#allocation2 + $0x20] sm:$0xff]  ;;  %828 = vmatpush.bf16.msra.mxu3 %v819_v13 }
  0x1d   :  { %78 = vst.msk [vmem:[#allocation2 + $0x34] sm:$0xf] %vm64_vm0, %v61_v61 }
  0x1e   :  { %750 = vmatmul.msk.bf16.gmra.mxu0 %vm261_vm1, %v798_v36  ;;  %127 = vst.msk [vmem:[#allocation2 + $0x78] sm:$0xf] %vm64_vm0, %v111_v0  ;;  %v810_v3 = vld [vmem:[#allocation2 + $0x68] sm:$0xff] }
  0x1f   :  { %759 = vmatmul.msk.bf16.gmra.mxu2 %vm261_vm1, %v807_v37  ;;  %128 = vst.msk [vmem:[#allocation2 + $0x7c] sm:$0xf] %vm64_vm0, %v112_v1  ;;  %519 = vmatpush.bf16.msra.mxu1 %v818_v19 }
  0x20   :  { %79 = vst.msk [vmem:[#allocation2 + $0x38] sm:$0xf] %vm64_vm0, %v62_v7  ;;  %v802_v9 = vld [vmem:[#allocation2 + $0x28] sm:$0xff]  ;;  %829 = vmatpush.bf16.msra.mxu3 %v818_v19 }
  0x21   :  { %80 = vst.msk [vmem:[#allocation2 + $0x3c] sm:$0xf] %vm64_vm0, %v63_v8 }
  0x22   :  { %v811_v10 = vld [vmem:[#allocation2 + $0x70] sm:$0xff]  ;;  %113 = vst.msk [vmem:[#allocation2 + $0x40] sm:$0xf] %vm64_vm0, %v97_v16 }
  0x23   :  { %114 = vst.msk [vmem:[#allocation2 + $0x44] sm:$0xf] %vm64_vm0, %v98_v17  ;;  %520 = vmatpush.bf16.msra.mxu1 %v817_v21 }
  0x24   :  { %v803_v18 = vld [vmem:[#allocation2 + $0x30] sm:$0xff]  ;;  %830 = vmatpush.bf16.msra.mxu3 %v817_v21 }
  0x26   :  { %v812_v20 = vld [vmem:[#allocation2 + $0x78] sm:$0xff] }
  0x27   :  { %521 = vmatpush.bf16.msra.mxu1 %v816_v22 }
  0x28   :  { %831 = vmatpush.bf16.msra.mxu3 %v816_v22  ;;  %v804_v24 = vld [vmem:[#allocation2 + $0x38] sm:$0xff] }
  0x2a   :  { %v805_v25 = vld [vmem:[#allocation2 + $0x40] sm:$0xff] }
  0x2b   :  { %522 = vmatpush.bf16.msra.mxu1 %v815_v23 }
  0x2c   :  { %832 = vmatpush.bf16.msra.mxu3 %v815_v23 }
  0x2e   :  { %751 = vmatmul.msk.bf16.gmra.mxu0 %vm261_vm1, %v799_v46 }
  0x2f   :  { %760 = vmatmul.msk.bf16.gmra.mxu2 %vm261_vm1, %v808_v47 }
  0x3e   :  { %752 = vmatmul.msk.bf16.gmra.mxu0 %vm261_vm1, %v800_v56 }
  0x3f   :  { %761 = vmatmul.msk.bf16.gmra.mxu2 %vm261_vm1, %v809_v57 }
  0x4e   :  { %753 = vmatmul.msk.bf16.gmra.mxu0 %vm261_vm1, %v801_v2 }
  0x4f   :  { %762 = vmatmul.msk.bf16.gmra.mxu2 %vm261_vm1, %v810_v3 }
  0x5e   :  { %754 = vmatmul.msk.bf16.gmra.mxu0 %vm261_vm1, %v802_v9 }
  0x5f   :  { %763 = vmatmul.msk.bf16.gmra.mxu2 %vm261_vm1, %v811_v10 }
  0x6e   :  { %755 = vmatmul.msk.bf16.gmra.mxu0 %vm261_vm1, %v803_v18 }
  0x6f   :  { %764 = vmatmul.msk.bf16.gmra.mxu2 %vm261_vm1, %v812_v20 }
  0x7e   :  { %756 = vmatmul.msk.bf16.gmra.mxu0 %vm261_vm1, %v804_v24 }
  0x8b   :  { %v319_v26 = vpop.f32.mrf.mxu0 }
  0x8c   :  { %v320_v28 = vadd.f32 %v1084_v27, %v319_v26 }
  0x8e   :  { %757 = vmatmul.msk.bf16.gmra.mxu0 %vm261_vm1, %v805_v25  ;;  %v399_v32 = vmax.f32 %v320_v28, 0.0 }
  0x92   :  { %v364_v29 = vpop.f32.mrf.mxu2 }
  0x93   :  { %v321_v30 = vpop.f32.mrf.mxu0  ;;  %v365_v35 = vadd.f32 %v1084_v27, %v364_v29 }
  0x94   :  { %v322_v31 = vadd.f32 %v1084_v27, %v321_v30 }
  0x95   :  { %v417_v39 = vmax.f32 %v365_v35, 0.0 }
  0x96   :  { %v400_v33 = vmax.f32 %v322_v31, 0.0 }
  0x98   :  { %v431_v34 = vpack.c.bf16 %v400_v33, %v399_v32 }
  0x9a   :  { %523 = vmatmul.bf16.vlgmr.msra.gmra.mxu1 %v431_v34  ;;  %v366_v36 = vpop.f32.mrf.mxu2 }
  0x9b   :  { %v324_v37 = vpop.f32.mrf.mxu0  ;;  %v367_v38 = vadd.f32 %v1084_v27, %v366_v36 }
  0x9c   :  { %v325_v42 = vadd.f32 %v1084_v27, %v324_v37 }
  0x9d   :  { %v418_v40 = vmax.f32 %v367_v38, 0.0 }
  0x9e   :  { %v401_v46 = vmax.f32 %v325_v42, 0.0 }
  0x9f   :  { %v440_v41 = vpack.c.bf16 %v418_v40, %v417_v39 }
  0xa1   :  { %568 = vmatmul.bf16.vlgmr.msra.gmra.mxu3 %v440_v41 }
  0xa2   :  { %v369_v43 = vpop.f32.mrf.mxu2 }
  0xa3   :  { %v326_v44 = vpop.f32.mrf.mxu0  ;;  %v370_v49 = vadd.f32 %v1084_v27, %v369_v43 }
  0xa4   :  { %v327_v45 = vadd.f32 %v1084_v27, %v326_v44 }
  0xa5   :  { %v419_v53 = vmax.f32 %v370_v49, 0.0 }
  0xa6   :  { %v402_v47 = vmax.f32 %v327_v45, 0.0 }
  0xa8   :  { %v432_v48 = vpack.c.bf16 %v402_v47, %v401_v46 }
  0xaa   :  { %528 = vmatmul.bf16.gmra.mxu1 %v432_v48  ;;  %v371_v50 = vpop.f32.mrf.mxu2 }
  0xab   :  { %v329_v51 = vpop.f32.mrf.mxu0  ;;  %v372_v52 = vadd.f32 %v1084_v27, %v371_v50 }
  0xac   :  { %v330_v56 = vadd.f32 %v1084_v27, %v329_v51 }
  0xad   :  { %v420_v54 = vmax.f32 %v372_v52, 0.0 }
  0xae   :  { %v403_v60 = vmax.f32 %v330_v56, 0.0 }
  0xaf   :  { %v441_v55 = vpack.c.bf16 %v420_v54, %v419_v53 }
  0xb1   :  { %573 = vmatmul.bf16.gmra.mxu3 %v441_v55 }
  0xb2   :  { %v374_v57 = vpop.f32.mrf.mxu2 }
  0xb3   :  { %v331_v58 = vpop.f32.mrf.mxu0  ;;  %v375_v63 = vadd.f32 %v1084_v27, %v374_v57 }
  0xb4   :  { %v332_v59 = vadd.f32 %v1084_v27, %v331_v58 }
  0xb5   :  { %v421_v3 = vmax.f32 %v375_v63, 0.0 }
  0xb6   :  { %v404_v61 = vmax.f32 %v332_v59, 0.0 }
  0xb8   :  { %v433_v62 = vpack.c.bf16 %v404_v61, %v403_v60 }
  0xba   :  { %533 = vmatmul.bf16.gmra.mxu1 %v433_v62  ;;  %v376_v0 = vpop.f32.mrf.mxu2 }
  0xbb   :  { %v334_v1 = vpop.f32.mrf.mxu0  ;;  %v377_v2 = vadd.f32 %v1084_v27, %v376_v0 }
  0xbc   :  { %v335_v6 = vadd.f32 %v1084_v27, %v334_v1 }
  0xbd   :  { %v422_v4 = vmax.f32 %v377_v2, 0.0 }
  0xbe   :  { %v405_v10 = vmax.f32 %v335_v6, 0.0 }
  0xbf   :  { %v442_v5 = vpack.c.bf16 %v422_v4, %v421_v3 }
  0xc1   :  { %578 = vmatmul.bf16.gmra.mxu3 %v442_v5 }
  0xc2   :  { %v379_v7 = vpop.f32.mrf.mxu2 }
  0xc3   :  { %v336_v8 = vpop.f32.mrf.mxu0  ;;  %v380_v13 = vadd.f32 %v1084_v27, %v379_v7 }
  0xc4   :  { %v337_v9 = vadd.f32 %v1084_v27, %v336_v8 }
  0xc5   :  { %v423_v17 = vmax.f32 %v380_v13, 0.0 }
  0xc6   :  { %v406_v11 = vmax.f32 %v337_v9, 0.0 }
  0xc8   :  { %v434_v12 = vpack.c.bf16 %v406_v11, %v405_v10 }
  0xca   :  { %538 = vmatmul.bf16.gmra.mxu1 %v434_v12  ;;  %v381_v14 = vpop.f32.mrf.mxu2 }
  0xcb   :  { %v339_v15 = vpop.f32.mrf.mxu0  ;;  %v382_v16 = vadd.f32 %v1084_v27, %v381_v14 }
  0xcc   :  { %v340_v20 = vadd.f32 %v1084_v27, %v339_v15  ;;  %v1126_v15 = vld [vmem:[%s1203_s5] ss:$0 sm:$0xff] }
  0xcd   :  { %v424_v18 = vmax.f32 %v382_v16, 0.0 }
  0xce   :  { %v407_v24 = vmax.f32 %v340_v20, 0.0 }
  0xcf   :  { %v443_v19 = vpack.c.bf16 %v424_v18, %v423_v17 }
  0xd1   :  { %583 = vmatmul.bf16.gmra.mxu3 %v443_v19 }
  0xd2   :  { %v384_v21 = vpop.f32.mrf.mxu2 }
  0xd3   :  { %v341_v22 = vpop.f32.mrf.mxu0  ;;  %v385_v28 = vadd.f32 %v1084_v27, %v384_v21 }
  0xd4   :  { %v342_v23 = vadd.f32 %v1084_v27, %v341_v22 }
  0xd5   :  { %v425_v32 = vmax.f32 %v385_v28, 0.0 }
  0xd6   :  { %v408_v25 = vmax.f32 %v342_v23, 0.0 }
  0xd8   :  { %v435_v26 = vpack.c.bf16 %v408_v25, %v407_v24 }
  0xda   :  { %543 = vmatmul.bf16.gmra.mxu1 %v435_v26  ;;  %v386_v29 = vpop.f32.mrf.mxu2 }
  0xdb   :  { %v344_v30 = vpop.f32.mrf.mxu0  ;;  %v387_v31 = vadd.f32 %v1084_v27, %v386_v29 }
  0xdc   :  { %v345_v35 = vadd.f32 %v1084_v27, %v344_v30 }
  0xdd   :  { %v426_v33 = vmax.f32 %v387_v31, 0.0 }
  0xde   :  { %v409_v39 = vmax.f32 %v345_v35, 0.0 }
  0xdf   :  { %v444_v34 = vpack.c.bf16 %v426_v33, %v425_v32 }
  0xe1   :  { %588 = vmatmul.bf16.gmra.mxu3 %v444_v34 }
  0xe2   :  { %v389_v36 = vpop.f32.mrf.mxu2 }
  0xe3   :  { %v346_v37 = vpop.f32.mrf.mxu0  ;;  %v390_v42 = vadd.f32 %v1084_v27, %v389_v36 }
  0xe4   :  { %v347_v38 = vadd.f32 %v1084_v27, %v346_v37 }
  0xe5   :  { %v427_v46 = vmax.f32 %v390_v42, 0.0 }
  0xe6   :  { %v410_v40 = vmax.f32 %v347_v38, 0.0 }
  0xe8   :  { %v436_v41 = vpack.c.bf16 %v410_v40, %v409_v39 }
  0xea   :  { %548 = vmatmul.bf16.gmra.mxu1 %v436_v41  ;;  %v391_v43 = vpop.f32.mrf.mxu2 }
  0xeb   :  { %v349_v44 = vpop.f32.mrf.mxu0  ;;  %v392_v45 = vadd.f32 %v1084_v27, %v391_v43 }
  0xec   :  { %v350_v49 = vadd.f32 %v1084_v27, %v349_v44 }
  0xed   :  { %v428_v47 = vmax.f32 %v392_v45, 0.0 }
  0xee   :  { %v411_v53 = vmax.f32 %v350_v49, 0.0 }
  0xef   :  { %v445_v48 = vpack.c.bf16 %v428_v47, %v427_v46 }
  0xf1   :  { %593 = vmatmul.bf16.gmra.mxu3 %v445_v48 }
  0xf2   :  { %v394_v50 = vpop.f32.mrf.mxu2 }
  0xf3   :  { %v351_v51 = vpop.f32.mrf.mxu0  ;;  %v395_v56 = vadd.f32 %v1084_v27, %v394_v50 }
  0xf4   :  { %v352_v52 = vadd.f32 %v1084_v27, %v351_v51 }
  0xf5   :  { %v429_v60 = vmax.f32 %v395_v56, 0.0 }
  0xf6   :  { %v412_v54 = vmax.f32 %v352_v52, 0.0 }
  0xf8   :  { %v437_v55 = vpack.c.bf16 %v412_v54, %v411_v53 }
  0xfa   :  { %553 = vmatmul.bf16.gmra.mxu1 %v437_v55  ;;  %v396_v57 = vpop.f32.mrf.mxu2 }
  0xfb   :  { %v354_v58 = vpop.f32.mrf.mxu0  ;;  %v397_v59 = vadd.f32 %v1084_v27, %v396_v57 }
  0xfc   :  { %v355_v63 = vadd.f32 %v1084_v27, %v354_v58 }
  0xfd   :  { %v430_v61 = vmax.f32 %v397_v59, 0.0 }
  0xfe   :  { %v413_v2 = vmax.f32 %v355_v63, 0.0 }
  0xff   :  { %v446_v62 = vpack.c.bf16 %v430_v61, %v429_v60 }
 0x101   :  { %598 = vmatmul.bf16.gmra.mxu3 %v446_v62 }
 0x103   :  { %v356_v0 = vpop.f32.mrf.mxu0 }
 0x104   :  { %v357_v1 = vadd.f32 %v1084_v27, %v356_v0 }
 0x106   :  { %v414_v3 = vmax.f32 %v357_v1, 0.0 }
 0x108   :  { %v438_v4 = vpack.c.bf16 %v414_v3, %v413_v2 }
 0x10a   :  { %558 = vmatmul.bf16.gmra.mxu1 %v438_v4 }
 0x10b   :  { %v359_v5 = vpop.f32.mrf.mxu0 }
 0x10c   :  { %v360_v6 = vadd.f32 %v1084_v27, %v359_v5 }
 0x10e   :  { %v415_v8 = vmax.f32 %v360_v6, 0.0 }
 0x113   :  { %v361_v7 = vpop.f32.mrf.mxu0 }
 0x114   :  { %v362_v9 = vadd.f32 %v1084_v27, %v361_v7 }
 0x116   :  { %v416_v10 = vmax.f32 %v362_v9, 0.0 }
 0x117   :  { %v1119_v11 = vpop.f32.mrf.mxu1 }
 0x118   :  { %v439_v12 = vpack.c.bf16 %v416_v10, %v415_v8 }
 0x11a   :  { %563 = vmatmul.bf16.gmra.mxu1 %v439_v12 }
 0x11f   :  { %v1121_v13 = vpop.f32.mrf.mxu1 }
 0x124   :  { %v569_v14 = vpop.f32.mrf.mxu3 }
 0x125   :  { %v570_v17 = vadd.f32 %v1126_v15, %v569_v14 }
 0x127   :  { %v529_v16 = vpop.f32.mrf.mxu1 }
 0x128   :  { %v530_v18 = vadd.f32 %v1126_v15, %v529_v16 }
 0x12a   :  { %v606_v19 = vsub.f32 %v530_v18, %v570_v17 }
 0x12c   :  { %v571_v27 = vpop.f32.mrf.mxu3  ;;  %v1132_v24 = vand.u32 2147483647, %v606_v19 }
 0x12d   :  { %v572_v21 = vadd.f32 %v1126_v15, %v571_v27 }
 0x12f   :  { %v531_v20 = vpop.f32.mrf.mxu1 }
 0x130   :  { %v532_v22 = vadd.f32 %v1126_v15, %v531_v20 }
 0x132   :  { %v607_v23 = vsub.f32 %v532_v22, %v572_v21 }
 0x134   :  { %v1134_v25 = vand.u32 2147483647, %v607_v23  ;;  %v574_v26 = vpop.f32.mrf.mxu3 }
 0x135   :  { %v575_v30 = vadd.f32 %v1126_v15, %v574_v26 }
 0x136   :  { %v638_v28 = vpack.c.bf16 %v1134_v25, %v1132_v24 }
 0x137   :  { %v534_v29 = vpop.f32.mrf.mxu1 }
 0x138   :  { %v535_v31 = vadd.f32 %v1126_v15, %v534_v29 }
 0x13a   :  { %v608_v32 = vsub.f32 %v535_v31, %v575_v30 }
 0x13c   :  { %v576_v33 = vpop.f32.mrf.mxu3  ;;  %v1142_v38 = vand.u32 2147483647, %v608_v32 }
 0x13d   :  { %v577_v35 = vadd.f32 %v1126_v15, %v576_v33 }
 0x13f   :  { %v536_v34 = vpop.f32.mrf.mxu1 }
 0x140   :  { %v537_v36 = vadd.f32 %v1126_v15, %v536_v34 }
 0x142   :  { %v609_v37 = vsub.f32 %v537_v36, %v577_v35 }
 0x144   :  { %v1144_v39 = vand.u32 2147483647, %v609_v37  ;;  %v579_v40 = vpop.f32.mrf.mxu3 }
 0x145   :  { %v580_v43 = vadd.f32 %v1126_v15, %v579_v40 }
 0x146   :  { %v639_v41 = vpack.c.bf16 %v1144_v39, %v1142_v38 }
 0x147   :  { %v539_v42 = vpop.f32.mrf.mxu1 }
 0x148   :  { %v540_v44 = vadd.f32 %v1126_v15, %v539_v42 }
 0x14a   :  { %v610_v45 = vsub.f32 %v540_v44, %v580_v43 }
 0x14c   :  { %v581_v46 = vpop.f32.mrf.mxu3  ;;  %v1152_v51 = vand.u32 2147483647, %v610_v45 }
 0x14d   :  { %v582_v48 = vadd.f32 %v1126_v15, %v581_v46  ;;  %v525_v46 = vadd.f32 %v1126_v15, %v1119_v11 }
 0x14f   :  { %v541_v47 = vpop.f32.mrf.mxu1 }
 0x150   :  { %v542_v49 = vadd.f32 %v1126_v15, %v541_v47 }
 0x152   :  { %v611_v50 = vsub.f32 %v542_v49, %v582_v48 }
 0x154   :  { %v1154_v52 = vand.u32 2147483647, %v611_v50  ;;  %v584_v53 = vpop.f32.mrf.mxu3 }
 0x155   :  { %v585_v56 = vadd.f32 %v1126_v15, %v584_v53  ;;  %v527_v53 = vadd.f32 %v1126_v15, %v1121_v13  ;;  %v636_v13 = vld [vmem:[%s1204_s6] sm:$0x1] }
 0x156   :  { %v640_v54 = vpack.c.bf16 %v1154_v52, %v1152_v51 }
 0x157   :  { %v544_v55 = vpop.f32.mrf.mxu1 }
 0x158   :  { %v545_v57 = vadd.f32 %v1126_v15, %v544_v55 }
 0x15a   :  { %v612_v58 = vsub.f32 %v545_v57, %v585_v56 }
 0x15c   :  { %v586_v59 = vpop.f32.mrf.mxu3  ;;  %v628_v0 = vand.u32 2147483647, %v612_v58 }
 0x15d   :  { %v587_v61 = vadd.f32 %v1126_v15, %v586_v59 }
 0x15f   :  { %v546_v60 = vpop.f32.mrf.mxu1 }
 0x160   :  { %v547_v62 = vadd.f32 %v1126_v15, %v546_v60 }
 0x162   :  { %v613_v63 = vsub.f32 %v547_v62, %v587_v61 }
 0x164   :  { %v629_v1 = vand.u32 2147483647, %v613_v63  ;;  %v589_v2 = vpop.f32.mrf.mxu3 }
 0x165   :  { %v590_v47 = vadd.f32 %v1126_v15, %v589_v2 }
 0x166   :  { %v641_v3 = vpack.c.bf16 %v629_v1, %v628_v0 }
 0x167   :  { %v549_v4 = vpop.f32.mrf.mxu1 }
 0x168   :  { %v550_v42 = vadd.f32 %v1126_v15, %v549_v4 }
 0x16a   :  { %v614_v55 = vsub.f32 %v550_v42, %v590_v47 }
 0x16c   :  { %v591_v5 = vpop.f32.mrf.mxu3  ;;  %v630_v60 = vand.u32 2147483647, %v614_v55 }
 0x16d   :  { %v592_v43 = vadd.f32 %v1126_v15, %v591_v5 }
 0x16f   :  { %v551_v6 = vpop.f32.mrf.mxu1 }
 0x170   :  { %v552_v37 = vadd.f32 %v1126_v15, %v551_v6 }
 0x172   :  { %v615_v48 = vsub.f32 %v552_v37, %v592_v43 }
 0x174   :  { %v594_v7 = vpop.f32.mrf.mxu3  ;;  %v631_v58 = vand.u32 2147483647, %v615_v48 }
 0x175   :  { %v595_v32 = vadd.f32 %v1126_v15, %v594_v7 }
 0x176   :  { %v642_v63 = vpack.c.bf16 %v631_v58, %v630_v60 }
 0x177   :  { %v554_v8 = vpop.f32.mrf.mxu1 }
 0x178   :  { %v555_v26 = vadd.f32 %v1126_v15, %v554_v8 }
 0x17a   :  { %v616_v36 = vsub.f32 %v555_v26, %v595_v32 }
 0x17c   :  { %v596_v9 = vpop.f32.mrf.mxu3  ;;  %v632_v44 = vand.u32 2147483647, %v616_v36 }
 0x17d   :  { %v597_v29 = vadd.f32 %v1126_v15, %v596_v9 }
 0x17f   :  { %v556_v10 = vpop.f32.mrf.mxu1 }
 0x180   :  { %v557_v22 = vadd.f32 %v1126_v15, %v556_v10 }
 0x182   :  { %v617_v33 = vsub.f32 %v557_v22, %v597_v29 }
 0x184   :  { %v599_v12 = vpop.f32.mrf.mxu3  ;;  %v633_v40 = vand.u32 2147483647, %v617_v33 }
 0x185   :  { %v600_v18 = vadd.f32 %v1126_v15, %v599_v12 }
 0x186   :  { %v643_v49 = vpack.c.bf16 %v633_v40, %v632_v44 }
 0x187   :  { %v559_v14 = vpop.f32.mrf.mxu1 }
 0x188   :  { %v560_v16 = vadd.f32 %v1126_v15, %v559_v14 }
 0x18a   :  { %v618_v27 = vsub.f32 %v560_v16, %v600_v18 }
 0x18c   :  { %v601_v17 = vpop.f32.mrf.mxu3  ;;  %v634_v30 = vand.u32 2147483647, %v618_v27 }
 0x18d   :  { %v602_v20 = vadd.f32 %v1126_v15, %v601_v17 }
 0x18f   :  { %v561_v19 = vpop.f32.mrf.mxu1 }
 0x190   :  { %v562_v21 = vadd.f32 %v1126_v15, %v561_v19 }
 0x192   :  { %v619_v23 = vsub.f32 %v562_v21, %v602_v20 }
 0x194   :  { %v635_v31 = vand.u32 2147483647, %v619_v23 }
 0x196   :  { %v644_v34 = vpack.c.bf16 %v635_v31, %v634_v30 }
 0x197   :  { %v564_v35 = vpop.f32.mrf.mxu1 }
 0x198   :  { %647 = vmatpush.bf16.xpose.msrb.mxu2 %v644_v34  ;;  %v565_v45 = vadd.f32 %v1126_v15, %v564_v35 }
 0x19a   :  { %v604_v56 = vsub.f32 %v525_v46, %v565_v45 }
 0x19c   :  { %v620_v61 = vand.u32 2147483647, %v604_v56 }
 0x19f   :  { %v566_v50 = vpop.f32.mrf.mxu1 }
 0x1a0   :  { %v567_v57 = vadd.f32 %v1126_v15, %v566_v50  ;;  %648 = vmatpush.bf16.xpose.msrb.mxu2 %v643_v49  ;;  %v646_v15 = vstv %s1205_s7 }
 0x1a2   :  { %v605_v59 = vsub.f32 %v527_v53, %v567_v57 }
 0x1a4   :  { %v621_v62 = vand.u32 2147483647, %v605_v59 }
 0x1a6   :  { %v637_v11 = vpack.c.bf16 %v621_v62, %v620_v61 }
 0x1a8   :  { %649 = vmatpush.bf16.xpose.msrb.mxu2 %v642_v63 }
 0x1b0   :  { %650 = vmatpush.bf16.xpose.msrb.mxu2 %v641_v3 }
 0x1b8   :  { %651 = vmatpush.bf16.xpose.msrb.mxu2 %v640_v54 }
 0x1c0   :  { %652 = vmatpush.bf16.xpose.msrb.mxu2 %v639_v41 }
 0x1c8   :  { %653 = vmatpush.bf16.xpose.msrb.mxu2 %v638_v28 }
 0x1d0   :  { %654 = vmatpush.bf16.xpose.msrb.mxu2 %v637_v11 }
 0x1d7   :  { %655 = vmatmul.bf16.vlgmr.msrb.gmra.mxu2 %v636_v13 }
 0x25a   :  { %v656_v38 = vpop.f32.mrf.mxu2 }
 0x25b   :  { %v657_v39 = vadd.f32 %v656_v38, %v646_v15 }
 0x25d   :  { %660 = vst [vmem:[#allocation4] sm:$0x1] %v657_v39 }
 0x25e   :  { %671 = dma.vmem_to_hbm [thread:$0]  %s667_s23, 16, %s669_s0, [#allocation5]  }
 0x262   :  { %v658_v24 = vpop.f32.mrf.mxu2 }
 0x263   :  { %860 = dma.done.wait [#allocation5], 16  }
 0x264   :  { %861 = vsyncadd [#allocation5], 4294967280 }
 0x265   :  { %676 = vsyncpa [#allocation5], 1 }

</bundles_post_ra>
